<compile_context>
chip_gen: v5e
topology: v5e:2x2
jax: 0.10.0
libtpu: 0.0.40
codegen_flags: <defaults>
</compile_context>

<pallas_src>
import functools

import jax
import jax.numpy as jnp
from jax.experimental import pallas as pl
from jax.experimental.pallas import tpu as pltpu


# ---------------------------------------------------------------------------
# Fast path kernel: whole (TB, C, HW) slab(s) per grid step.
# ---------------------------------------------------------------------------
def _ln2d_fused_kernel(x_ref, w_ref, b_ref, o_ref, *, eps, n_elems):
    """x_ref/o_ref: (TB, C, HW); w_ref/b_ref: (1, C, 1)."""
    x = x_ref[...].astype(jnp.float32)

    # Two-pass per-sample statistics.  The (x - mean)**2 intermediate is
    # consumed directly by the reduction (no second full-size slab kept).
    mean = jnp.sum(x, axis=(1, 2), keepdims=True) / n_elems            # (TB,1,1)
    # Unbiased (n-1) variance, matching torch.Tensor.std default.
    # n_elems == 1 gives 0/0 -> NaN, same degenerate behavior as torch.
    var = jnp.sum((x - mean) ** 2, axis=(1, 2), keepdims=True) / (n_elems - 1)
    inv = 1.0 / (jnp.sqrt(var) + eps)                                  # (TB,1,1)

    # Fold normalize + per-channel affine into one FMA per element.
    w = w_ref[...].astype(jnp.float32)                                 # (1,C,1)
    b = b_ref[...].astype(jnp.float32)                                 # (1,C,1)
    scale = w * inv                                                    # (TB,C,1)
    shift = b - mean * scale                                           # (TB,C,1)
    o_ref[...] = (x * scale + shift).astype(o_ref.dtype)


# ---------------------------------------------------------------------------
# Tiled path (samples too large for VMEM): 3 small kernels.
# ---------------------------------------------------------------------------
def _partial_sum_kernel(x_ref, s_ref):
    """Accumulate sum(x) over tiles into a per-sample (1,1,1) accumulator."""
    @pl.when(pl.program_id(1) == 0)
    def _init():
        s_ref[...] = jnp.zeros_like(s_ref)

    x = x_ref[...].astype(jnp.float32)
    s_ref[...] += jnp.sum(x, axis=(0, 1, 2), keepdims=True)


def _partial_sqdev_kernel(mean_ref, x_ref, s_ref):
    """Accumulate sum((x - mean)^2) over tiles (mean is per-sample)."""
    @pl.when(pl.program_id(1) == 0)
    def _init():
        s_ref[...] = jnp.zeros_like(s_ref)

    d = x_ref[...].astype(jnp.float32) - mean_ref[...]
    s_ref[...] += jnp.sum(d * d, axis=(0, 1, 2), keepdims=True)


def _apply_affine_kernel(scale_ref, shift_ref, x_ref, o_ref):
    """y = x * scale_c + shift_c, scale/shift precomputed per (sample, channel)."""
    x = x_ref[...].astype(jnp.float32)
    o_ref[...] = (x * scale_ref[...] + shift_ref[...]).astype(o_ref.dtype)


# ---------------------------------------------------------------------------
# Tiling helpers
# ---------------------------------------------------------------------------
def _largest_divisor(n, pred):
    best = 1
    for d in range(1, n + 1):
        if n % d == 0 and pred(d):
            best = d
    return best


def _pick_tile(hw, c, bytes_per_elem, budget):
    """Pick a (grid_axis, tile) for the tiled path.

    Prefers lane-dense spatial tiles (multiples of 128 dividing HW); falls back
    to sublane-aligned channel tiles (multiples of 8 dividing C).  Returns
    (None, None) if neither fits the per-block budget.
    """
    # Spatial tiling: block (1, C, t), t a multiple of 128 dividing HW.
    if hw % 128 == 0:
        best = None
        t = 128
        while t <= hw:
            if hw % t == 0 and c * t * bytes_per_elem <= budget:
                best = t
            t += 128
        if best is not None:
            return 2, best
    # Channel tiling: block (1, tc, HW), tc a multiple of 8 dividing C.
    if c % 8 == 0:
        best = None
        tc = 8
        while tc <= c:
            if c % tc == 0 and tc * hw * bytes_per_elem <= budget:
                best = tc
            tc += 8
        if best is not None:
            return 1, best
    return None, None


def _vmem_limit(block_bytes):
    # Double-buffered in+out blocks, f32 temps, plus headroom; keep within
    # [32 MiB, 64 MiB] so it is valid on v7x (64 MiB physical) and raises
    # v5e's 16 MiB scoped default.
    needed = 2 * block_bytes + (1 << 20)
    return int(min(max(2 * needed, 32 << 20), 64 << 20))


# ---------------------------------------------------------------------------
# Wrapper
# ---------------------------------------------------------------------------
def _fast_path(x3, w3, b3, tb, eps, n_elems, per_sample_bytes):
    N, C, HW = x3.shape
    block_bytes = tb * per_sample_bytes + 2 * C * 4
    kernel = functools.partial(_ln2d_fused_kernel, eps=eps, n_elems=n_elems)
    return pl.pallas_call(
        kernel,
        out_shape=jax.ShapeDtypeStruct((N, C, HW), x3.dtype),
        grid_spec=pltpu.PrefetchScalarGridSpec(
            num_scalar_prefetch=0,
            grid=(N // tb,),
            in_specs=[
                pl.BlockSpec((tb, C, HW), lambda i: (i, 0, 0)),
                pl.BlockSpec((1, C, 1), lambda i: (0, 0, 0)),
                pl.BlockSpec((1, C, 1), lambda i: (0, 0, 0)),
            ],
            out_specs=pl.BlockSpec((tb, C, HW), lambda i: (i, 0, 0)),
        ),
        compiler_params=pltpu.CompilerParams(
            dimension_semantics=("parallel",),
            vmem_limit_bytes=_vmem_limit(block_bytes),
        ),
    )(x3, w3, b3)


def layernorm2d(x, weight, bias, *, eps=1e-5, max_block_bytes=8 << 20):
    """x: (N, C, H, W); weight, bias: (C,). Returns (N, C, H, W)."""
    N, C, H, W = x.shape
    HW = H * W
    n_elems = C * HW
    in_b = jnp.dtype(x.dtype).itemsize
    out_b = in_b
    per_sample_bytes = C * HW * (in_b + out_b)

    x3 = x.reshape(N, C, HW)
    w3 = weight.reshape(1, C, 1)
    b3 = bias.reshape(1, C, 1)

    if per_sample_bytes <= max_block_bytes:
        # -------- fast path: whole sample(s) per grid step --------
        # Pack batch elements per step to amortize per-step overhead, but keep
        # >= 2 grid steps (when N >= 2) for megacore balance on v7x.
        tb_cap = max(1, N // 2)
        tb = _largest_divisor(
            N, lambda d: d * per_sample_bytes <= max_block_bytes and d <= tb_cap
        )
        out = _fast_path(x3, w3, b3, tb, eps, n_elems, per_sample_bytes)
        return out.reshape(N, C, H, W)

    tile_axis, tile = _pick_tile(HW, C, in_b + out_b, max_block_bytes)
    if tile_axis is None:
        # TODO(synk): HW not lane-tileable and C not sublane-tileable; fall
        # back to one whole sample per step (may exceed VMEM for huge samples).
        out = _fast_path(x3, w3, b3, 1, eps, n_elems, per_sample_bytes)
        return out.reshape(N, C, H, W)

    # -------- tiled path: per-sample partial stats + fused FMA apply --------
    if tile_axis == 2:      # spatial tiles (lane-dense)
        n_tiles = HW // tile
        x_spec = pl.BlockSpec((1, C, tile), lambda i, j: (i, 0, j))
        chan_spec = pl.BlockSpec((1, C, 1), lambda i, j: (i, 0, 0))
        block_in_bytes = C * tile * in_b
    else:                   # channel tiles (sublane-aligned)
        n_tiles = C // tile
        x_spec = pl.BlockSpec((1, tile, HW), lambda i, j: (i, j, 0))
        chan_spec = pl.BlockSpec((1, tile, 1), lambda i, j: (i, j, 0))
        block_in_bytes = tile * HW * in_b

    stat_spec = pl.BlockSpec((1, 1, 1), lambda i, j: (i, 0, 0))
    vlim_stats = _vmem_limit(block_in_bytes)
    vlim_apply = _vmem_limit(block_in_bytes * 2)
    stats_shape = jax.ShapeDtypeStruct((N, 1, 1), jnp.float32)

    s1 = pl.pallas_call(
        _partial_sum_kernel,
        out_shape=stats_shape,
        grid_spec=pltpu.PrefetchScalarGridSpec(
            num_scalar_prefetch=0,
            grid=(N, n_tiles),
            in_specs=[x_spec],
            out_specs=stat_spec,
        ),
        compiler_params=pltpu.CompilerParams(
            dimension_semantics=("parallel", "arbitrary"),
            vmem_limit_bytes=vlim_stats,
        ),
    )(x3)
    mean = s1 / n_elems                                    # (N,1,1) f32

    s2 = pl.pallas_call(
        _partial_sqdev_kernel,
        out_shape=stats_shape,
        grid_spec=pltpu.PrefetchScalarGridSpec(
            num_scalar_prefetch=0,
            grid=(N, n_tiles),
            in_specs=[stat_spec, x_spec],
            out_specs=stat_spec,
        ),
        compiler_params=pltpu.CompilerParams(
            dimension_semantics=("parallel", "arbitrary"),
            vmem_limit_bytes=vlim_stats,
        ),
    )(mean, x3)

    var = s2 / (n_elems - 1)                               # unbiased
    inv = 1.0 / (jnp.sqrt(var) + eps)                      # (N,1,1)
    scale = w3.astype(jnp.float32) * inv                   # (N,C,1)
    shift = b3.astype(jnp.float32) - mean * scale          # (N,C,1)

    out = pl.pallas_call(
        _apply_affine_kernel,
        out_shape=jax.ShapeDtypeStruct((N, C, HW), x.dtype),
        grid_spec=pltpu.PrefetchScalarGridSpec(
            num_scalar_prefetch=0,
            grid=(N, n_tiles),
            in_specs=[chan_spec, chan_spec, x_spec],
            out_specs=x_spec,
        ),
        compiler_params=pltpu.CompilerParams(
            dimension_semantics=("parallel", "parallel"),
            vmem_limit_bytes=vlim_apply,
        ),
    )(scale, shift, x3)
    return out.reshape(N, C, H, W)


def _reference(x, weight, bias, eps):
    C = x.shape[1]
    n = x.shape[1] * x.shape[2] * x.shape[3]
    mean = x.mean(axis=(1, 2, 3), keepdims=True)
    var = ((x - mean) ** 2).sum(axis=(1, 2, 3), keepdims=True) / (n - 1)
    y = (x - mean) / (jnp.sqrt(var) + eps)
    return weight.reshape(1, C, 1, 1) * y + bias.reshape(1, C, 1, 1)


if __name__ == "__main__":
    key = jax.random.PRNGKey(0)
    N, C, H, W = 2, 4, 16, 16
    x = jax.random.normal(key, (N, C, H, W), dtype=jnp.float32)

    # Deterministic parameters matching nn.Parameter(torch.ones / torch.zeros)
    weight = jnp.ones((C,), dtype=jnp.float32)
    bias = jnp.zeros((C,), dtype=jnp.float32)

    out = layernorm2d(x, weight, bias, eps=1e-5)
    out = jax.block_until_ready(out)
    ref = _reference(x, weight, bias, 1e-5)
    assert jnp.allclose(out, ref, atol=1e-5, rtol=1e-5)

    # Exercise the spatially-tiled path (HW=256 is 128-tileable) by forcing a
    # tiny per-block budget.
    out_tiled = layernorm2d(x, weight, bias, eps=1e-5, max_block_bytes=4096)
    out_tiled = jax.block_until_ready(out_tiled)
    assert jnp.allclose(out_tiled, ref, atol=1e-5, rtol=1e-5)

    # Exercise the channel-tiled path (HW not a multiple of 128, C % 8 == 0).
    key2 = jax.random.PRNGKey(0)
    N2, C2, H2, W2 = 2, 16, 10, 10
    x2 = jax.random.normal(key2, (N2, C2, H2, W2), dtype=jnp.float32)
    w2 = jnp.ones((C2,), dtype=jnp.float32)
    b2 = jnp.zeros((C2,), dtype=jnp.float32)
    out2 = layernorm2d(x2, w2, b2, eps=1e-5, max_block_bytes=8192)
    out2 = jax.block_until_ready(out2)
    ref2 = _reference(x2, w2, b2, 1e-5)
    assert jnp.allclose(out2, ref2, atol=1e-5, rtol=1e-5)

    print("KERNEL_OK")
</pallas_src>

<mosaic_0001>
module attributes {stable_mosaic.version = 11 : i64} {
  func.func @_ln2d_fused_kernel(%arg0: i32, %arg1: memref<1x4x256xf32, #tpu.memory_space<vmem>>, %arg2: memref<1x4x1xf32, #tpu.memory_space<vmem>>, %arg3: memref<1x4x1xf32, #tpu.memory_space<vmem>>, %arg4: memref<1x4x256xf32, #tpu.memory_space<vmem>>) attributes {dimension_semantics = [#tpu.dimension_semantics<parallel>], iteration_bounds = array<i64: 2>, scalar_prefetch = 0 : i64, scratch_operands = 0 : i64, tpu.core_type = #tpu.core_type<tc>, window_params = [{transform_indices = @transform_0, window_bounds = array<i64: 1, 4, 256>}, {pipeline_mode = #tpu.pipeline_mode<synchronous>, transform_indices = @transform_1, window_bounds = array<i64: 1, 4, 1>}, {pipeline_mode = #tpu.pipeline_mode<synchronous>, transform_indices = @transform_2, window_bounds = array<i64: 1, 4, 1>}, {transform_indices = @transform_3, window_bounds = array<i64: 1, 4, 256>}]} {
    %c0 = arith.constant 0 : index
    %c0_0 = arith.constant 0 : index
    %c0_1 = arith.constant 0 : index
    %0 = vector.load %arg1[%c0, %c0_0, %c0_1] : memref<1x4x256xf32, #tpu.memory_space<vmem>>, vector<1x4x256xf32>
    %cst = arith.constant dense<0.000000e+00> : vector<1xf32>
    %1 = vector.multi_reduction <add>, %0, %cst [1, 2] : vector<1x4x256xf32> to vector<1xf32>
    %2 = vector.shape_cast %1 : vector<1xf32> to vector<1x1x1xf32>
    %cst_2 = arith.constant 1.024000e+03 : f32
    %3 = vector.broadcast %cst_2 : f32 to vector<1x1x1xf32>
    %4 = arith.divf %2, %3 : vector<1x1x1xf32>
    %5 = vector.broadcast %4 : vector<1x1x1xf32> to vector<1x4x256xf32>
    %6 = arith.subf %0, %5 : vector<1x4x256xf32>
    %7 = arith.mulf %6, %6 : vector<1x4x256xf32>
    %cst_3 = arith.constant dense<0.000000e+00> : vector<1xf32>
    %8 = vector.multi_reduction <add>, %7, %cst_3 [1, 2] : vector<1x4x256xf32> to vector<1xf32>
    %9 = vector.shape_cast %8 : vector<1xf32> to vector<1x1x1xf32>
    %cst_4 = arith.constant 1.023000e+03 : f32
    %10 = vector.broadcast %cst_4 : f32 to vector<1x1x1xf32>
    %11 = arith.divf %9, %10 : vector<1x1x1xf32>
    %12 = math.sqrt %11 : vector<1x1x1xf32>
    %cst_5 = arith.constant 9.99999974E-6 : f32
    %13 = vector.broadcast %cst_5 : f32 to vector<1x1x1xf32>
    %14 = arith.addf %12, %13 : vector<1x1x1xf32>
    %cst_6 = arith.constant 1.000000e+00 : f32
    %15 = vector.broadcast %cst_6 : f32 to vector<1x1x1xf32>
    %16 = arith.divf %15, %14 : vector<1x1x1xf32>
    %c0_7 = arith.constant 0 : index
    %c0_8 = arith.constant 0 : index
    %c0_9 = arith.constant 0 : index
    %17 = vector.load %arg2[%c0_7, %c0_8, %c0_9] : memref<1x4x1xf32, #tpu.memory_space<vmem>>, vector<1x4x1xf32>
    %c0_10 = arith.constant 0 : index
    %c0_11 = arith.constant 0 : index
    %c0_12 = arith.constant 0 : index
    %18 = vector.load %arg3[%c0_10, %c0_11, %c0_12] : memref<1x4x1xf32, #tpu.memory_space<vmem>>, vector<1x4x1xf32>
    %19 = vector.broadcast %16 : vector<1x1x1xf32> to vector<1x4x1xf32>
    %20 = arith.mulf %17, %19 : vector<1x4x1xf32>
    %21 = vector.broadcast %4 : vector<1x1x1xf32> to vector<1x4x1xf32>
    %22 = arith.mulf %21, %20 : vector<1x4x1xf32>
    %23 = arith.subf %18, %22 : vector<1x4x1xf32>
    %24 = vector.broadcast %20 : vector<1x4x1xf32> to vector<1x4x256xf32>
    %25 = arith.mulf %0, %24 : vector<1x4x256xf32>
    %26 = vector.broadcast %23 : vector<1x4x1xf32> to vector<1x4x256xf32>
    %27 = arith.addf %25, %26 : vector<1x4x256xf32>
    %c0_13 = arith.constant 0 : index
    %c0_14 = arith.constant 0 : index
    %c0_15 = arith.constant 0 : index
    %28 = vector.load %arg4[%c0_13, %c0_14, %c0_15] : memref<1x4x256xf32, #tpu.memory_space<vmem>>, vector<1x4x256xf32>
    tpu.vector_store %arg4[%c0_13, %c0_14, %c0_15], %27 {strides = array<i32>} : memref<1x4x256xf32, #tpu.memory_space<vmem>>, vector<1x4x256xf32>,
    return
  }
  func.func @transform_0(%arg0: i32) -> (i32, i32, i32) {
    %c0_i32 = arith.constant 0 : i32
    %c0_i32_0 = arith.constant 0 : i32
    %c0_i32_1 = arith.constant 0 : i32
    return %arg0, %c0_i32, %c0_i32_0 : i32, i32, i32
  }
  func.func @transform_1(%arg0: i32) -> (i32, i32, i32) {
    %c0_i32 = arith.constant 0 : i32
    %c0_i32_0 = arith.constant 0 : i32
    %c0_i32_1 = arith.constant 0 : i32
    %c0_i32_2 = arith.constant 0 : i32
    return %c0_i32, %c0_i32_0, %c0_i32_1 : i32, i32, i32
  }
  func.func @transform_2(%arg0: i32) -> (i32, i32, i32) {
    %c0_i32 = arith.constant 0 : i32
    %c0_i32_0 = arith.constant 0 : i32
    %c0_i32_1 = arith.constant 0 : i32
    %c0_i32_2 = arith.constant 0 : i32
    return %c0_i32, %c0_i32_0, %c0_i32_1 : i32, i32, i32
  }
  func.func @transform_3(%arg0: i32) -> (i32, i32, i32) {
    %c0_i32 = arith.constant 0 : i32
    %c0_i32_0 = arith.constant 0 : i32
    %c0_i32_1 = arith.constant 0 : i32
    return %arg0, %c0_i32, %c0_i32_0 : i32, i32, i32
  }
}

</mosaic_0001>

<bundles_post_ra>
// kernel: tpu_custom_call.1
= control target key start
LH: loop header
LB: loop body
LE: loop exit
PB: predicated region body
PF: predicated region fallthrough
CT: control target
= control target key end

     0   :  { %8 = vsyncpa [#allocation3], 0  ;;  %s728_s0 = inlined_call_operand.hbm [shape: f32[2,4,256], index: 0, kind: input, shape index: {}]   ;;  %s729_s1 = inlined_call_operand.vmem [shape: f32[1,4,1], index: 1, kind: input, shape index: {}]   ;;  %s730_s2 = inlined_call_operand.vmem [shape: f32[1,4,1], index: 2, kind: input, shape index: {}]   ;;  %s731_s3 = inlined_call_operand.hbm [shape: f32[2,4,256], index: 3, kind: output, shape index: {}]  }
   0x1   :  { %10 = vsyncpa [#allocation3 + $0x1], 0 }
   0x2   :  { %11 = vsyncpa [#allocation4], 0 }
   0x3   :  { %13 = vsyncpa [#allocation4 + $0x1], 0  ;;  %s582_s12 = smov 0   ;;  %s584_s13 = smov 0  }
   0x4   :  { %s586_s14 = smov 0   ;;  %s588_s15 = smov 0  }
   0x5 LB: > { %s603_s16 = sadd.s32 4294967295, %s556_s15   ;;  %s384_s17 = sadd.s32 4294967294, %s556_s15   ;;  %s556_s15 = sphi %s588_s15, %s741_s15   ;;  %s552_s14 = sphi %s586_s14, %s740_s14   ;;  %s548_s13 = sphi %s584_s13, %s739_s13   ;;  %s544_s12 = sphi %s582_s12, %s738_s12  }
   0x6   : > { %s607_s18 = sadd.s32 1, %s556_s15   ;;  %s26_s19 = sadd.s32 1, %s552_s14 }
   0x7   : > { %s23_s20 = ssub.s32 %s556_s15, %s607_s18  ;;  %p33_p0 = scmp.ne.s32.totalorder %s552_s14, %s548_s13 }
   0x8   : > { %p24_p1 = scmp.eq.s32.totalorder %s23_s20, 0  ;;  %p34_p2 = scmp.eq.s32.totalorder %s556_s15, 0 }
   0x9   : > { %p39_p3 = scmp.ne.s32.totalorder %s548_s13, %s544_s12  ;;  %p40_p4 = scmp.eq.s32.totalorder %s603_s16, 0 }
   0xa   : > { %s619_s21 = scalar_select %p24_p1, %s552_s14, %s26_s19  }
   0xb   : > { %p621_p5 = por %p34_p2, %p33_p0  ;;  %p625_p6 = por %p40_p4, %p39_p3 }
   0xc   : > { %p105_p7 = scmp.eq.s32.totalorder %s603_s16, 1  ;;  %p111_p8 = scmp.eq.s32.totalorder %s384_s17, 1 }
   0xd   : > { %p412_p10 = scmp.lt.s32.totalorder %s556_s15, 2  ;;  %s137_s26 = sand.u32 1, %s552_s14  }
   0xe   : > { %p632_p11 = por %p105_p7, %p33_p0  ;;  %p636_p12 = por %p111_p8, %p39_p3 }
   0xf   : > { %s398_s27 = sshll.u32 %s556_s15, 3  ;;  %s387_s28 = sshll.u32 %s137_s26, 3 }
  0x10   : > { %s146_s4 = scalar_lea.hbm %s728_s0, %s398_s27  ;;  %s141_s6 = scalar_lea.vmem [#allocation2], %s387_s28 }
  0x11   : > { %s148_s5 = sshll.u32 %s146_s4, 4  ;;  %s150_s7 = sshll.u32 %s141_s6, 4  ;;  %s149_s5 = int_to_ptr.hbm [resolvable:$true] %s148_s5  ;;  %s151_s7 = int_to_ptr.vmem [resolvable:$true] %s150_s7 }
  0x12   : > { %p647_p13 = pnand %p412_p10, %p621_p5  ;;  %p390_p0 = scmp.ge.s32.totalorder %s556_s15, 1 }
  0x13   : > { %p155_p1 = scmp.lt.s32.totalorder %s556_s15, 3  ;;  %s138_s9 = scalar_lea.sflag [#allocation3], %s137_s26 }
  0x14   : > { %s460_s10 = sshra.s32 %s149_s5, 4  ;;  %p464_p3 = pneg %p647_p13  ;;  %s461_s10 = int_to_ptr.hbm [resolvable:$true] %s460_s10 }
  0x15   : > { %s462_s11 = scalar_lea.hbm %s461_s10, 8  ;;  %s467_s20 = scalar_lea.hbm %s728_s0, 16 }
  0x16   : > { %p463_p2 = scmp.ne.s32.totalorder %s461_s10, %s462_s11  ;;  %p468_p5 = scmp.lt.s32.totalorder %s461_s10, %s728_s0 }
  0x17   : > { %p469_p8 = scmp.lt.s32.totalorder %s467_s20, %s462_s11 }
  0x18   : > { %p465_p4 = pnand %p464_p3, %p463_p2 }
  0x19   : > { %p470_p10 = por %p469_p8, %p468_p5 }
  0x1a   : > { %p466_p7 = pneg %p465_p4 }
  0x1c   : > { %p471_p9 = pnand %p470_p10, %p466_p7 }
  0x1e   : > { %474 = shalt.err (!%p471_p9)
}
  0x1f   : > { %407 = dma.hbm_to_vmem [thread:$0]  (!%p647_p13), %s149_s5, 128, %s151_s7, %s138_s9  }
  0x20   : > { %p156_p2 = pnand %p390_p0, %p155_p1 }
  0x21   : > { %s668_s26 = sand.u32 (!%p156_p2), 1, %s548_s13  }
  0x22   : > { %159 = sbr.rel (%p156_p2) target bundleno = 499 (0x1f3), region = 32  ;;  %s391_s28 = sshll.u32 (!%p156_p2), %s668_s26, 3 }
  0x23   : > { %s162_s29 = scalar_lea.sflag (!%p156_p2), [#allocation3], %s668_s26  ;;  %s165_s30 = scalar_lea.vmem (!%p156_p2), [#allocation2], %s391_s28 }
  0x27   : > { %535 = dma.done.wait (%p625_p6), %s162_s29, 128  }
  0x28   : > { %537 = vsyncadd (%p625_p6), %s162_s29, 4294967168  ;;  %v678_v0 = vld [vmem:[%s165_s30] sm:$0xff]  ;;  %vm196_vm0 = vcmask 1043456   ;;  %v558_v6 = vmov 1024.0   ;;  %v559_v28 = vmov 1023.0   ;;  %v560_v30 = vmov 0  }
  0x29   : > { %191 = vst [vmem:[#allocation1] ss:$2 sm:$0xff] %v678_v0  ;;  %452 = vrcp.f32 %v558_v6  ;;  %450 = vset.pattern.permute.xlu1 %v560_v30  ;;  %451 = vset.pattern.permute.xlu0 %v560_v30  ;;  %v271_v63 = vld [vmem:[%s729_s1] sm:$0xf]  ;;  %s399_s7 = sshll.u32 %s603_s16, 3  ;;  %s188_s11 = scalar_lea.vmem [#allocation5], %s391_s28 }
  0x2a   : > { %454 = vrcp.f32 %v559_v28  ;;  %s309_s10 = scalar_lea.hbm %s731_s3, %s399_s7  ;;  %s311_s17 = sshll.u32 %s188_s11, 4  ;;  %s312_s17 = int_to_ptr.vmem [resolvable:$true] %s311_s17 }
  0x2b   : > { %s313_s19 = sshll.u32 %s309_s10, 4  ;;  %s298_s20 = scalar_lea.sflag [#allocation4], %s668_s26  ;;  %s314_s19 = int_to_ptr.hbm [resolvable:$true] %s313_s19 }
  0x2c   : > { %s504_s16 = sshra.s32 %s314_s19, 4  ;;  %s510_s28 = scalar_lea.hbm %s731_s3, 16  ;;  %s505_s16 = int_to_ptr.hbm [resolvable:$true] %s504_s16 }
  0x2d   : > { %s506_s22 = scalar_lea.hbm %s505_s16, 8  ;;  %p511_p0 = scmp.lt.s32.totalorder %s505_s16, %s731_s3 }
  0x2e   : > { %p507_p6 = scmp.ne.s32.totalorder %s505_s16, %s506_s22  ;;  %p512_p1 = scmp.lt.s32.totalorder %s510_s28, %s506_s22 }
  0x2f   : > { %v453_v7 = vpop.eup %452 }
  0x30   : > { %v192_v1 = vld.sshfl [vmem:[#allocation1] sm:$0xff pattern:$0x75316420]  ;;  %v193_v2 = vld.sshfl [vmem:[#allocation1 + $0x8] sm:$0xff pattern:$0x75316420]  ;;  %vm213_vm1 = vweird.f32 %v453_v7  ;;  %v455_v29 = vpop.eup %454  ;;  %p508_p9 = pnand %p507_p6, %p632_p11  ;;  %p513_p3 = por %p512_p1, %p511_p0 }
  0x31   : > { %v197_v3 = vsel %vm196_vm0, %v192_v1, 0.0  ;;  %v198_v4 = vsel %vm196_vm0, %v193_v2, 0.0  ;;  %v209_v8 = vmul.f32 1024.0, %v453_v7  ;;  %v236_v31 = vmul.f32 1023.0, %v455_v29 }
  0x32   : > { %v199_v5 = vadd.f32 %v198_v4, %v197_v3  ;;  %vm240_vm2 = vweird.f32 %v455_v29  ;;  %p509_p13 = pneg %p508_p9 }
  0x33   : > { %v210_v9 = vsub.f32 1.0, %v209_v8  ;;  %v237_v32 = vsub.f32 1.0, %v236_v31 }
  0x34   : > { %200 = vadd.xlane.f32.xlu0 %v199_v5  ;;  %v272_v5 = vld [vmem:[%s730_s2] sm:$0xf]  ;;  %p514_p4 = pnand %p513_p3, %p509_p13 }
  0x35   : > { %v211_v12 = vmul.f32 %v453_v7, %v210_v9  ;;  %v238_v35 = vmul.f32 %v455_v29, %v237_v32 }
  0x37   : > { %v212_v15 = vadd.f32 %v453_v7, %v211_v12  ;;  %v239_v38 = vadd.f32 %v455_v29, %v238_v35 }
  0x39   : > { %v214_v18 = vsel %vm213_vm1, %v453_v7, %v212_v15  ;;  %v241_v41 = vsel %vm240_vm2, %v455_v29, %v239_v38  ;;  %v561_v7 = vmov 839922192  }
  0x3a   : > { %v281_v8 = vunpack.c.l.s4 %v561_v7 }
  0xa7   : > { %v201_v10 = vpop.xlane.xlu0 %200 }
  0xa8   : > { %v202_v11 = vrot.slane %v201_v10, 4 }
  0xaa   : > { %v203_v13 = vadd.f32 %v202_v11, %v201_v10  ;;  %v282_v10 = vunpack.c.0.s8 %v281_v8 }
  0xac   : > { %v204_v14 = vrot.slane %v203_v13, 2 }
  0xae   : > { %v205_v16 = vadd.f32 %v204_v14, %v203_v13 }
  0xb0   : > { %v206_v17 = vrot.slane %v205_v16, 1 }
  0xb2   : > { %v207_v19 = vadd.f32 %v206_v17, %v205_v16 }
  0xb4   : > { %v215_v20 = vmul.f32 %v214_v18, %v207_v19 }
  0xb6   : > { %v216_v21 = vsub.f32 %v678_v0, %v215_v20 }
  0xb8   : > { %v217_v22 = vmul.f32 %v216_v21, %v216_v21 }
  0xba   : > { %219 = vst [vmem:[#allocation1] ss:$2 sm:$0xff] %v217_v22 }
  0xc1   : > { %v220_v23 = vld.sshfl [vmem:[#allocation1] sm:$0xff pattern:$0x75316420]  ;;  %v221_v24 = vld.sshfl [vmem:[#allocation1 + $0x8] sm:$0xff pattern:$0x75316420] }
  0xc2   : > { %v224_v25 = vsel %vm196_vm0, %v220_v23, 0.0  ;;  %v225_v26 = vsel %vm196_vm0, %v221_v24, 0.0 }
  0xc3   : > { %v226_v27 = vadd.f32 %v225_v26, %v224_v25 }
  0xc5   : > { %227 = vadd.xlane.f32.xlu0 %v226_v27 }
 0x138   : > { %v228_v33 = vpop.xlane.xlu0 %227 }
 0x139   : > { %v229_v34 = vrot.slane %v228_v33, 4 }
 0x13b   : > { %v230_v36 = vadd.f32 %v229_v34, %v228_v33 }
 0x13d   : > { %v231_v37 = vrot.slane %v230_v36, 2 }
 0x13f   : > { %v232_v39 = vadd.f32 %v231_v37, %v230_v36 }
 0x141   : > { %v233_v40 = vrot.slane %v232_v39, 1 }
 0x143   : > { %v234_v42 = vadd.f32 %v233_v40, %v232_v39 }
 0x145   : > { %v242_v43 = vmul.f32 %v241_v41, %v234_v42 }
 0x147   : > { %456 = vrsqrt.f32 %v242_v43  ;;  %vm250_vm3 = vcmp.eq.f32.partialorder %v242_v43, inf  ;;  %v253_v51 = vand.u32 2147483648, %v242_v43  ;;  %vm252_vm4 = vcmp.eq.f32.partialorder %v242_v43, 0.0 }
 0x14d   : > { %v457_v44 = vpop.eup %456 }
 0x14e   : > { %v244_v45 = vmul.f32 %v457_v44, %v242_v43 }
 0x150   : > { %v245_v46 = vmul.f32 %v457_v44, %v244_v45 }
 0x152   : > { %v246_v47 = vmul.f32 0.5, %v245_v46 }
 0x154   : > { %v247_v48 = vsub.f32 1.5, %v246_v47 }
 0x156   : > { %v248_v49 = vmul.f32 %v457_v44, %v247_v48 }
 0x158   : > { %v249_v50 = vmul.f32 %v248_v49, %v242_v43 }
 0x15a   : > { %v251_v52 = vsel %vm250_vm3, %v242_v43, %v249_v50 }
 0x15b   : > { %v254_v53 = vsel %vm252_vm4, %v253_v51, %v251_v52 }
 0x15c   : > { %v255_v54 = vadd.f32 1e-05, %v254_v53 }
 0x15e   : > { %458 = vrcp.f32 %v255_v54  ;;  %v267_v58 = vand.u32 2147483648, %v255_v54  ;;  %v265_v60 = vand.u32 2147483647, %v255_v54  ;;  %vm261_vm6 = vweird.f32 %v255_v54 }
 0x160   : > { %v268_v62 = vor.u32 1.1754944e-38, %v267_v58  ;;  %vm266_vm8 = vcmp.eq.f32.partialorder %v265_v60, 8.507059e+37 }
 0x164   : > { %v459_v55 = vpop.eup %458 }
 0x165   : > { %v257_v56 = vmul.f32 %v459_v55, %v255_v54  ;;  %vm262_vm5 = vweird.f32 %v459_v55 }
 0x166   : > { %vm263_vm7 = vmor %vm261_vm6, %vm262_vm5 }
 0x167   : > { %v258_v57 = vsub.f32 1.0, %v257_v56 }
 0x169   : > { %v259_v59 = vmul.f32 %v459_v55, %v258_v57 }
 0x16b   : > { %v260_v61 = vadd.f32 %v459_v55, %v259_v59 }
 0x16d   : > { %v264_v1 = vsel %vm263_vm7, %v459_v55, %v260_v61 }
 0x16e   : > { %v269_v2 = vsel %vm266_vm8, %v268_v62, %v264_v1 }
 0x16f   : > { %v273_v3 = vmul.f32 %v271_v63, %v269_v2 }
 0x171   : > { %278 = vperm.xlu1 %450, %v273_v3   ;;  %v274_v4 = vmul.f32 %v273_v3, %v215_v20 }
 0x173   : > { %v275_v6 = vsub.f32 %v272_v5, %v274_v4 }
 0x179   : > { %288 = vperm.xlu1 %450, %v275_v6  }
 0x1e3   : > { %v279_v9 = vpop.permute.xlu1 %278 }
 0x1e4   : > { %v283_v11 = vperm.slane %v279_v9, %v282_v10 }
 0x1e6   : > { %v285_v13 = vmul.f32 %v283_v11, %v678_v0 }
 0x1eb   : > { %v289_v12 = vpop.permute.xlu1 %288 }
 0x1ec   : > { %v293_v14 = vperm.slane %v289_v12, %v282_v10 }
 0x1ee   : > { %v295_v15 = vadd.f32 %v293_v14, %v285_v13 }
 0x1f0   : > { %296 = vst [vmem:[%s188_s11] sm:$0xff] %v295_v15 }
 0x1f1   : > { %517 = shalt.err (!%p514_p4)
}
 0x1f2   : > { %402 = dma.vmem_to_hbm [thread:$0]  (%p632_p11), %s312_s17, 128, %s314_s19, %s298_s20  }
 0x1f3 PF: > { %s325_s26 = sand.u32 1, %s544_s12   ;;  %p737_p7 = scmp.ge.s32.totalorder %s556_s15, 2 }
 0x1f4   : > { %s326_s4 = scalar_lea.sflag [#allocation4], %s325_s26 }
 0x1f5   : > { %p409_p5 = pnand %p737_p7, %p636_p12 }
 0x1f7   : > { %p410_p8 = pneg %p409_p5 }
 0x1f9   : > { %539 = dma.done.wait (%p410_p8), %s326_s4, 128  }
 0x1fa   : > { %541 = vsyncadd (%p410_p8), %s326_s4, 4294967168  ;;  %p16_p10 = scmp.ge.s32.totalorder %s607_s18, 4   ;;  %s738_s12 = smov %s548_s13 }
 0x1fb   : > { %s739_s13 = smov %s552_s14  ;;  %s740_s14 = smov %s619_s21 }
 0x1fc   : > { %s741_s15 = smov %s607_s18  ;;  %18 = sbr.rel (!%p16_p10) target bundleno = 5 (0x5), region = 77 }
 0x201   :  { %332 = vsyncpa [#allocation3], 1 }
 0x202   :  { %334 = vsyncpa [#allocation3 + $0x1], 1 }
 0x203   :  { %335 = vsyncpa [#allocation4], 1 }
 0x204   :  { %337 = vsyncpa [#allocation4 + $0x1], 1 }

</bundles_post_ra>
